<compile_context>
chip_gen: v5e
topology: v5e:2x2
jax: 0.10.0
libtpu: 0.0.40
codegen_flags: <defaults>
</compile_context>

<pallas_src>
import jax
import jax.numpy as jnp
from jax.experimental import pallas as pl
from jax.experimental.pallas import tpu as pltpu


def _attention_kernel(g_ref, x_ref, wg_ref, bg_ref, wx_ref, bx_ref,
                      wpsi_ref, bpsi_ref, o_ref):
    """Refs (channels on sublanes, spatial on lanes):
      g_ref:    (F_g,  T)     x_ref:  (F_l, T)
      wg_ref:   (F_int, F_g)  bg_ref: (F_int, 1)
      wx_ref:   (F_int, F_l)  bx_ref: (F_int, 1)
      wpsi_ref: (F_int, 1)    bpsi_ref: (1,) scalar in SMEM
      o_ref:    (F_l, T)
    Fused: g1 = Wg@G + bg ; x1 = Wx@X + bx ; a = relu(g1+x1) ;
           psi = sigmoid(sum_c(wpsi[c]*a[c,:]) + bpsi) ; out = X * psi."""
    g1 = jnp.dot(wg_ref[...], g_ref[...],
                 preferred_element_type=jnp.float32) + bg_ref[...]
    x1 = jnp.dot(wx_ref[...], x_ref[...],
                 preferred_element_type=jnp.float32) + bx_ref[...]
    a = jnp.maximum(g1 + x1, 0.0)                       # (F_int, T) ReLU

    # 1-output conv as VPU multiply + sublane (XLU) reduce — no MXU needed.
    psi_lin = jnp.sum(a * wpsi_ref[...], axis=0, keepdims=True) + bpsi_ref[0]
    psi = jax.nn.sigmoid(psi_lin)                       # (1, T)

    o_ref[...] = (x_ref[...] * psi).astype(o_ref.dtype)  # gate x, lane-dense


def attention_block_pallas(g, x, params, *, tile_hw=512):
    """g: (N, F_g, H, W), x: (N, F_l, H, W)  (NCHW, like PyTorch).
    Returns x * psi with shape (N, F_l, H, W)."""
    wg, bg, wx, bx, wpsi, bpsi = params
    N, F_g, H, W = g.shape
    _, F_l, _, _ = x.shape
    F_int = wg.shape[0]
    HW = H * W

    # Free reshapes (merge trailing contiguous dims) — no transpose, no pad.
    g3 = g.reshape(N, F_g, HW)
    x3 = x.reshape(N, F_l, HW)

    # Spatial tile: full extent if small, else a multiple of 128.
    if HW <= tile_hw:
        t_hw = HW
    else:
        t_hw = max(128, (tile_hw // 128) * 128)

    grid = (N, pl.cdiv(HW, t_hw))

    # VMEM budget: double-buffered g/x/out tiles + resident weights + slack.
    elt = jnp.dtype(x.dtype).itemsize
    tile_bytes = (F_g + 2 * F_l) * t_hw * elt
    weight_bytes = 4 * (F_int * (F_g + F_l) + 3 * F_int + 1)
    vmem_limit = int(min(max(4 * tile_bytes + weight_bytes + (4 << 20),
                             16 << 20), 32 << 20))

    out = pl.pallas_call(
        _attention_kernel,
        out_shape=jax.ShapeDtypeStruct((N, F_l, HW), x.dtype),
        grid_spec=pltpu.PrefetchScalarGridSpec(
            num_scalar_prefetch=0,
            grid=grid,
            in_specs=[
                pl.BlockSpec((None, F_g, t_hw), lambda n, i: (n, 0, i)),  # g
                pl.BlockSpec((None, F_l, t_hw), lambda n, i: (n, 0, i)),  # x
                pl.BlockSpec((F_int, F_g), lambda n, i: (0, 0)),          # Wg
                pl.BlockSpec((F_int, 1), lambda n, i: (0, 0)),            # bg
                pl.BlockSpec((F_int, F_l), lambda n, i: (0, 0)),          # Wx
                pl.BlockSpec((F_int, 1), lambda n, i: (0, 0)),            # bx
                pl.BlockSpec((F_int, 1), lambda n, i: (0, 0)),            # Wpsi
                pl.BlockSpec(memory_space=pltpu.MemorySpace.SMEM),        # bpsi
            ],
            out_specs=pl.BlockSpec((None, F_l, t_hw), lambda n, i: (n, 0, i)),
        ),
        compiler_params=pltpu.CompilerParams(
            dimension_semantics=("parallel", "parallel"),
            vmem_limit_bytes=vmem_limit),
    )(g3, x3, wg, bg, wx, bx, wpsi, bpsi)

    return out.reshape(N, F_l, H, W)


def init_params(key, F_g, F_l, F_int, eps=1e-5):
    """Deterministic param init, PyTorch conv orientation (C_out, C_in);
    BN (eval mode: mean=0, var=1, gamma=1, beta=0) folded into weight/bias."""
    k1, k2, k3, k4, k5, k6 = jax.random.split(key, 6)
    bn_scale = 1.0 / jnp.sqrt(1.0 + eps)   # gamma / sqrt(running_var + eps)

    wg = jax.random.normal(k1, (F_int, F_g), jnp.float32) * 0.1
    bg = jax.random.normal(k2, (F_int, 1), jnp.float32) * 0.1
    wx = jax.random.normal(k3, (F_int, F_l), jnp.float32) * 0.1
    bx = jax.random.normal(k4, (F_int, 1), jnp.float32) * 0.1
    wpsi = jax.random.normal(k5, (F_int, 1), jnp.float32) * 0.1  # (C_in, 1)
    bpsi = jax.random.normal(k6, (1,), jnp.float32) * 0.1

    # fold BN: y = scale * conv(x) + 0   (mean=0, beta=0)
    wg, bg = wg * bn_scale, bg * bn_scale
    wx, bx = wx * bn_scale, bx * bn_scale
    wpsi, bpsi = wpsi * bn_scale, bpsi * bn_scale
    return (wg, bg, wx, bx, wpsi, bpsi)


def attention_block_ref(g, x, params):
    """Pure-JAX reference (same folded-BN semantics) for sanity checking."""
    wg, bg, wx, bx, wpsi, bpsi = params
    N, F_g, H, W = g.shape
    F_l = x.shape[1]
    g3 = g.reshape(N, F_g, H * W)
    x3 = x.reshape(N, F_l, H * W)
    g1 = jnp.einsum('oc,ncs->nos', wg, g3) + bg[None]
    x1 = jnp.einsum('oc,ncs->nos', wx, x3) + bx[None]
    a = jnp.maximum(g1 + x1, 0.0)
    psi = jax.nn.sigmoid(jnp.einsum('co,ncs->nos', wpsi, a) + bpsi)
    return (x3 * psi).reshape(N, F_l, H, W)


if __name__ == "__main__":
    key = jax.random.PRNGKey(0)
    kg, kx, kp = jax.random.split(key, 3)

    N, H, W = 2, 16, 16
    F_g, F_l, F_int = 4, 4, 8

    g = jax.random.normal(kg, (N, F_g, H, W), jnp.float32)
    x = jax.random.normal(kx, (N, F_l, H, W), jnp.float32)
    params = init_params(kp, F_g, F_l, F_int)

    out = attention_block_pallas(g, x, params)
    out = jax.block_until_ready(out)

    ref = attention_block_ref(g, x, params)
    assert out.shape == (N, F_l, H, W)
    assert jnp.allclose(out, ref, atol=1e-5, rtol=1e-5)

    print("KERNEL_OK")
</pallas_src>

<mosaic_0001>
module attributes {stable_mosaic.version = 11 : i64} {
  func.func @_attention_kernel(%arg0: i32, %arg1: i32, %arg2: memref<1x4x256xf32, #tpu.memory_space<vmem>>, %arg3: memref<1x4x256xf32, #tpu.memory_space<vmem>>, %arg4: memref<8x4xf32, #tpu.memory_space<vmem>>, %arg5: memref<8x1xf32, #tpu.memory_space<vmem>>, %arg6: memref<8x4xf32, #tpu.memory_space<vmem>>, %arg7: memref<8x1xf32, #tpu.memory_space<vmem>>, %arg8: memref<8x1xf32, #tpu.memory_space<vmem>>, %arg9: memref<1xf32, #tpu.memory_space<smem>>, %arg10: memref<1x4x256xf32, #tpu.memory_space<vmem>>) attributes {dimension_semantics = [#tpu.dimension_semantics<parallel>, #tpu.dimension_semantics<parallel>], iteration_bounds = array<i64: 2, 1>, scalar_prefetch = 0 : i64, scratch_operands = 0 : i64, tpu.core_type = #tpu.core_type<tc>, window_params = [{transform_indices = @transform_0, window_bounds = array<i64: 1, 4, 256>}, {transform_indices = @transform_1, window_bounds = array<i64: 1, 4, 256>}, {pipeline_mode = #tpu.pipeline_mode<synchronous>, transform_indices = @transform_2, window_bounds = array<i64: 8, 4>}, {pipeline_mode = #tpu.pipeline_mode<synchronous>, transform_indices = @transform_3, window_bounds = array<i64: 8, 1>}, {pipeline_mode = #tpu.pipeline_mode<synchronous>, transform_indices = @transform_4, window_bounds = array<i64: 8, 4>}, {pipeline_mode = #tpu.pipeline_mode<synchronous>, transform_indices = @transform_5, window_bounds = array<i64: 8, 1>}, {pipeline_mode = #tpu.pipeline_mode<synchronous>, transform_indices = @transform_6, window_bounds = array<i64: 8, 1>}, {transform_indices = @transform_7, window_bounds = array<i64: 1>}, {transform_indices = @transform_8, window_bounds = array<i64: 1, 4, 256>}]} {
    %c0 = arith.constant 0 : index
    %c0_0 = arith.constant 0 : index
    %0 = vector.load %arg4[%c0, %c0_0] : memref<8x4xf32, #tpu.memory_space<vmem>>, vector<8x4xf32>
    %c0_1 = arith.constant 0 : index
    %c0_2 = arith.constant 0 : index
    %c0_3 = arith.constant 0 : index
    %1 = vector.load %arg2[%c0_1, %c0_2, %c0_3] : memref<1x4x256xf32, #tpu.memory_space<vmem>>, vector<1x4x256xf32>
    %2 = vector.shape_cast %1 : vector<1x4x256xf32> to vector<4x256xf32>
    %cst = arith.constant dense<0.000000e+00> : vector<8x256xf32>
    %3 = tpu.matmul %0, %2, %cst {dimension_numbers = #tpu.dot_dimension_numbers<[1], [0], [0], [1], [0, 0, 1, 1], [], []>} : vector<8x4xf32>, vector<4x256xf32>, vector<8x256xf32> -> vector<8x256xf32>
    %c0_4 = arith.constant 0 : index
    %c0_5 = arith.constant 0 : index
    %4 = vector.load %arg5[%c0_4, %c0_5] : memref<8x1xf32, #tpu.memory_space<vmem>>, vector<8x1xf32>
    %5 = vector.broadcast %4 : vector<8x1xf32> to vector<8x256xf32>
    %6 = arith.addf %3, %5 : vector<8x256xf32>
    %c0_6 = arith.constant 0 : index
    %c0_7 = arith.constant 0 : index
    %7 = vector.load %arg6[%c0_6, %c0_7] : memref<8x4xf32, #tpu.memory_space<vmem>>, vector<8x4xf32>
    %c0_8 = arith.constant 0 : index
    %c0_9 = arith.constant 0 : index
    %c0_10 = arith.constant 0 : index
    %8 = vector.load %arg3[%c0_8, %c0_9, %c0_10] : memref<1x4x256xf32, #tpu.memory_space<vmem>>, vector<1x4x256xf32>
    %9 = vector.shape_cast %8 : vector<1x4x256xf32> to vector<4x256xf32>
    %cst_11 = arith.constant dense<0.000000e+00> : vector<8x256xf32>
    %10 = tpu.matmul %7, %9, %cst_11 {dimension_numbers = #tpu.dot_dimension_numbers<[1], [0], [0], [1], [0, 0, 1, 1], [], []>} : vector<8x4xf32>, vector<4x256xf32>, vector<8x256xf32> -> vector<8x256xf32>
    %c0_12 = arith.constant 0 : index
    %c0_13 = arith.constant 0 : index
    %11 = vector.load %arg7[%c0_12, %c0_13] : memref<8x1xf32, #tpu.memory_space<vmem>>, vector<8x1xf32>
    %12 = vector.broadcast %11 : vector<8x1xf32> to vector<8x256xf32>
    %13 = arith.addf %10, %12 : vector<8x256xf32>
    %14 = arith.addf %6, %13 : vector<8x256xf32>
    %cst_14 = arith.constant 0.000000e+00 : f32
    %15 = vector.broadcast %cst_14 : f32 to vector<8x256xf32>
    %16 = arith.maximumf %14, %15 : vector<8x256xf32>
    %c0_15 = arith.constant 0 : index
    %c0_16 = arith.constant 0 : index
    %17 = vector.load %arg8[%c0_15, %c0_16] : memref<8x1xf32, #tpu.memory_space<vmem>>, vector<8x1xf32>
    %18 = vector.broadcast %17 : vector<8x1xf32> to vector<8x256xf32>
    %19 = arith.mulf %16, %18 : vector<8x256xf32>
    %cst_17 = arith.constant dense<0.000000e+00> : vector<256xf32>
    %20 = vector.multi_reduction <add>, %19, %cst_17 [0] : vector<8x256xf32> to vector<256xf32>
    %21 = vector.shape_cast %20 : vector<256xf32> to vector<1x256xf32>
    %c0_18 = arith.constant 0 : index
    %22 = memref.load %arg9[%c0_18] : memref<1xf32, #tpu.memory_space<smem>>
    %23 = vector.broadcast %22 : f32 to vector<1x256xf32>
    %24 = arith.addf %21, %23 : vector<1x256xf32>
    %25 = arith.negf %24 : vector<1x256xf32>
    %26 = math.exp %25 : vector<1x256xf32>
    %cst_19 = arith.constant 1.000000e+00 : f32
    %27 = vector.broadcast %cst_19 : f32 to vector<1x256xf32>
    %28 = arith.addf %27, %26 : vector<1x256xf32>
    %29 = arith.divf %27, %28 : vector<1x256xf32>
    %c0_20 = arith.constant 0 : index
    %c0_21 = arith.constant 0 : index
    %c0_22 = arith.constant 0 : index
    %30 = vector.load %arg3[%c0_20, %c0_21, %c0_22] : memref<1x4x256xf32, #tpu.memory_space<vmem>>, vector<1x4x256xf32>
    %31 = vector.shape_cast %30 : vector<1x4x256xf32> to vector<4x256xf32>
    %32 = vector.broadcast %29 : vector<1x256xf32> to vector<4x256xf32>
    %33 = arith.mulf %31, %32 : vector<4x256xf32>
    %c0_23 = arith.constant 0 : index
    %c0_24 = arith.constant 0 : index
    %c0_25 = arith.constant 0 : index
    %34 = vector.load %arg10[%c0_23, %c0_24, %c0_25] : memref<1x4x256xf32, #tpu.memory_space<vmem>>, vector<1x4x256xf32>
    %35 = vector.shape_cast %34 : vector<1x4x256xf32> to vector<4x256xf32>
    %36 = vector.shape_cast %33 : vector<4x256xf32> to vector<1x4x256xf32>
    tpu.vector_store %arg10[%c0_23, %c0_24, %c0_25], %36 {strides = array<i32>} : memref<1x4x256xf32, #tpu.memory_space<vmem>>, vector<1x4x256xf32>,
    return
  }
  func.func @transform_0(%arg0: i32, %arg1: i32) -> (i32, i32, i32) {
    %c0_i32 = arith.constant 0 : i32
    %c0_i32_0 = arith.constant 0 : i32
    return %arg0, %c0_i32, %arg1 : i32, i32, i32
  }
  func.func @transform_1(%arg0: i32, %arg1: i32) -> (i32, i32, i32) {
    %c0_i32 = arith.constant 0 : i32
    %c0_i32_0 = arith.constant 0 : i32
    return %arg0, %c0_i32, %arg1 : i32, i32, i32
  }
  func.func @transform_2(%arg0: i32, %arg1: i32) -> (i32, i32) {
    %c0_i32 = arith.constant 0 : i32
    %c0_i32_0 = arith.constant 0 : i32
    %c0_i32_1 = arith.constant 0 : i32
    return %c0_i32, %c0_i32_0 : i32, i32
  }
  func.func @transform_3(%arg0: i32, %arg1: i32) -> (i32, i32) {
    %c0_i32 = arith.constant 0 : i32
    %c0_i32_0 = arith.constant 0 : i32
    %c0_i32_1 = arith.constant 0 : i32
    return %c0_i32, %c0_i32_0 : i32, i32
  }
  func.func @transform_4(%arg0: i32, %arg1: i32) -> (i32, i32) {
    %c0_i32 = arith.constant 0 : i32
    %c0_i32_0 = arith.constant 0 : i32
    %c0_i32_1 = arith.constant 0 : i32
    return %c0_i32, %c0_i32_0 : i32, i32
  }
  func.func @transform_5(%arg0: i32, %arg1: i32) -> (i32, i32) {
    %c0_i32 = arith.constant 0 : i32
    %c0_i32_0 = arith.constant 0 : i32
    %c0_i32_1 = arith.constant 0 : i32
    return %c0_i32, %c0_i32_0 : i32, i32
  }
  func.func @transform_6(%arg0: i32, %arg1: i32) -> (i32, i32) {
    %c0_i32 = arith.constant 0 : i32
    %c0_i32_0 = arith.constant 0 : i32
    %c0_i32_1 = arith.constant 0 : i32
    return %c0_i32, %c0_i32_0 : i32, i32
  }
  func.func @transform_7(%arg0: i32, %arg1: i32) -> i32 {
    %c0_i32 = arith.constant 0 : i32
    %c0_i32_0 = arith.constant 0 : i32
    return %c0_i32 : i32
  }
  func.func @transform_8(%arg0: i32, %arg1: i32) -> (i32, i32, i32) {
    %c0_i32 = arith.constant 0 : i32
    %c0_i32_0 = arith.constant 0 : i32
    return %arg0, %c0_i32, %arg1 : i32, i32, i32
  }
}

</mosaic_0001>

<bundles_post_ra>
// kernel: tpu_custom_call.1
= control target key start
LH: loop header
LB: loop body
LE: loop exit
PB: predicated region body
PF: predicated region fallthrough
CT: control target
= control target key end

     0   :  { %s1038_s0 = inlined_call_operand.vmem [shape: f32[2,4,256], index: 0, kind: input, shape index: {}]   ;;  %s1039_s1 = inlined_call_operand.vmem [shape: f32[2,4,256], index: 1, kind: input, shape index: {}]   ;;  %s1040_s2 = inlined_call_operand.vmem [shape: f32[8,4], index: 2, kind: input, shape index: {}]   ;;  %s1041_s3 = inlined_call_operand.vmem [shape: f32[8,1], index: 3, kind: input, shape index: {}]   ;;  %s1042_s4 = inlined_call_operand.vmem [shape: f32[8,4], index: 4, kind: input, shape index: {}]   ;;  %s1043_s5 = inlined_call_operand.vmem [shape: f32[8,1], index: 5, kind: input, shape index: {}]   ;;  %s1044_s6 = inlined_call_operand.vmem [shape: f32[8,1], index: 6, kind: input, shape index: {}]   ;;  %s1045_s7 = inlined_call_operand.<no memory space> [shape: f32[1], index: 7, kind: input, shape index: {}]   ;;  %s1046_s8 = inlined_call_operand.hbm [shape: f32[2,4,256], index: 8, kind: output, shape index: {}]  }
   0x1   :  { %13 = sst [smem:[#allocation2]] %s1045_s7 }
   0x2   :  { %14 = vsyncpa [#allocation4], 0 }
   0x3   :  { %16 = vsyncpa [#allocation4 + $0x1], 0  ;;  %s901_s29 = smov 0   ;;  %s903_s30 = smov 0  }
   0x4   :  { %s905_s9 = smov 0   ;;  %s907_s10 = smov 0  }
   0x5   :  { %s909_s11 = smov 0   ;;  %s911_s12 = smov 0  }
   0x6 LB: > { %s678_s7 = sadd.s32 4294967295, %s850_s12   ;;  %s679_s13 = sadd.s32 4294967294, %s850_s12   ;;  %s850_s12 = sphi %s911_s12, %s22_s12   ;;  %s846_s11 = sphi %s909_s11, %s1055_s11   ;;  %s842_s10 = sphi %s907_s10, %s1054_s10   ;;  %s838_s9 = sphi %s905_s9, %s1053_s9   ;;  %s834_s30 = sphi %s903_s30, %s1052_s30   ;;  %s830_s29 = sphi %s901_s29, %s1051_s29  }
   0x7   : > { %s34_s14 = sadd.s32 1, %s846_s11  ;;  %s225_s15 = sadd.s32 1, %s838_s9 }
   0x8   : > { %p36_p0 = scmp.ge.s32.totalorder %s34_s14, 2  ;;  %p235_p1 = scmp.ne.s32.totalorder %s838_s9, %s834_s30 }
   0x9   : > { %p236_p2 = scmp.eq.s32.totalorder %s678_s7, 1  ;;  %p241_p3 = scmp.ne.s32.totalorder %s834_s30, %s830_s29 }
   0xa   : > { %s1057_s14 = smov (%p36_p0, %s34_s14), 0  ;;  %p242_p5 = scmp.eq.s32.totalorder %s679_s13, 1 }
   0xb   : > { %p941_p4 = por %p236_p2, %p235_p1  ;;  %s220_s17 = ssub.s32 %s846_s11, %s1057_s14 }
   0xc   : > { %p682_p6 = scmp.ge.s32.totalorder %s850_s12, 1  ;;  %p223_p7 = scmp.eq.s32.totalorder %s220_s17, 0 }
   0xd   : > { %p948_p8 = por %p242_p5, %p241_p3  ;;  %p304_p9 = scmp.lt.s32.totalorder %s850_s12, 3 }
   0xe   : > { %s954_s19 = scalar_select %p223_p7, %s838_s9, %s225_s15  }
   0xf   : > { %p305_p10 = pnand %p682_p6, %p304_p9 }
  0x10   : > { %p352_p11 = scmp.lt.s32.totalorder (!%p305_p10), %s842_s10, 1  ;;  %s348_s26 = sand.u32 (!%p305_p10), 1, %s834_s30  }
  0x11   : > { %308 = sbr.rel (%p305_p10) target bundleno = 235 (0xeb), region = 52  ;;  %s989_s27 = sshll.u32 (!%p305_p10), %s348_s26, 3 }
  0x12   : > { %s566_s21 = scalar_lea.sflag (!%p305_p10), [#allocation4], %s348_s26 }
  0x16   : > { %v852_v0 = vmov 0   ;;  %v374_v1 = vld [vmem:[%s1041_s3] sm:$0xff]  ;;  %s353_s24 = scalar_select %p352_p11, %s842_s10, 1  ;;  %vm388_vm0 = vcmask 1043456   ;;  %vm384_vm1 = vcmask 31744  }
  0x17   : > { %762 = vset.pattern.permute.xlu0 %v852_v0  ;;  %763 = vset.pattern.permute.xlu1 %v852_v0  ;;  %v496_v2 = vld [vmem:[%s1044_s6] sm:$0xff] }
  0x18   : > { %377 = vperm.xlu0 %762, %v374_v1   ;;  %499 = vperm.xlu1 %763, %v496_v2   ;;  %s703_s25 = sshll.u32 %s353_s24, 3  ;;  %v435_v4 = vld [vmem:[%s1043_s5] sm:$0xff] }
  0x19   : > { %s359_s28 = scalar_lea.vmem %s1038_s0, %s703_s25  ;;  %s369_s20 = scalar_lea.vmem %s1039_s1, %s703_s25  ;;  %v372_v6 = vld [vmem:[%s1040_s2] sm:$0xff] }
  0x1a   : > { %v373_v3 = vld [vmem:[%s359_s28] sm:$0xff]  ;;  %s516_s25 = sld [smem:[#allocation2]]  ;;  %s705_s28 = sshll.u32 %s842_s10, 3 }
  0x1b   : > { %381 = vst [vmem:[#allocation1] ss:$2 sm:$0xff] %v373_v3  ;;  %v973_v5 = vld [vmem:[%s369_s20] sm:$0xff]  ;;  %s579_s15 = scalar_lea.hbm %s1046_s8, %s705_s28  ;;  %s350_s10 = scalar_lea.vmem [#allocation3], %s989_s27 }
  0x1c   : > { %v433_v9 = vld [vmem:[%s1042_s4] sm:$0xff]  ;;  %s581_s17 = sshll.u32 %s350_s10, 4  ;;  %s583_s20 = sshll.u32 %s579_s15, 4  ;;  %s582_s17 = int_to_ptr.vmem [resolvable:$true] %s581_s17  ;;  %s584_s20 = int_to_ptr.hbm [resolvable:$true] %s583_s20 }
  0x1d   : > { %s786_s22 = sshra.s32 %s584_s20, 4  ;;  %s792_s27 = scalar_lea.hbm %s1046_s8, 16  ;;  %s787_s22 = int_to_ptr.hbm [resolvable:$true] %s786_s22 }
  0x1e   : > { %s788_s23 = scalar_lea.hbm %s787_s22, 8  ;;  %p793_p1 = scmp.lt.s32.totalorder %s787_s22, %s1046_s8 }
  0x1f   : > { %p789_p12 = scmp.ne.s32.totalorder %s787_s22, %s788_s23  ;;  %p794_p2 = scmp.lt.s32.totalorder %s792_s27, %s788_s23 }
  0x20   : > { %438 = vperm.xlu0 %762, %v435_v4   ;;  %v517_v39 = vstv %s516_s25 }
  0x21   : > { %p790_p13 = pnand %p789_p12, %p941_p4  ;;  %p795_p3 = por %p794_p2, %p793_p1 }
  0x22   : > { %v382_v7 = vld.sshfl [vmem:[#allocation1] sm:$0xff pattern:$0x75316420]  ;;  %v383_v8 = vld.sshfl [vmem:[#allocation1 + $0x8] sm:$0xff pattern:$0x75316420] }
  0x23   : > { %688 = vmatpush.msk.msra.mxu0 %vm388_vm0, %v382_v7  ;;  %690 = vmatpush.msk.msra.mxu1 %vm388_vm0, %v383_v8  ;;  %442 = vst [vmem:[#allocation1] ss:$2 sm:$0xff] %v973_v5  ;;  %p791_p0 = pneg %p790_p13 }
  0x24   : > { %689 = vmatmul.msk.f32.vlgmr.msra.gmra.mxu0 %vm384_vm1, %v372_v6  ;;  %691 = vmatmul.msk.f32.vlgmr.msra.gmra.mxu1 %vm384_vm1, %v372_v6 }
  0x25   : > { %p796_p5 = pnand %p795_p3, %p791_p0 }
  0x2a   : > { %v443_v10 = vld.sshfl [vmem:[#allocation1] sm:$0xff pattern:$0x75316420]  ;;  %v444_v11 = vld.sshfl [vmem:[#allocation1 + $0x8] sm:$0xff pattern:$0x75316420] }
  0x2b   : > { %692 = vmatpush.msk.msra.mxu2 %vm388_vm0, %v443_v10  ;;  %694 = vmatpush.msk.msra.mxu3 %vm388_vm0, %v444_v11 }
  0x2c   : > { %693 = vmatmul.msk.f32.vlgmr.msra.gmra.mxu2 %vm384_vm1, %v433_v9  ;;  %695 = vmatmul.msk.f32.vlgmr.msra.gmra.mxu3 %vm384_vm1, %v433_v9 }
  0x8a   : > { %v378_v12 = vpop.permute.xlu0 %377  ;;  %v500_v24 = vpop.permute.xlu1 %499 }
  0x92   : > { %v439_v15 = vpop.permute.xlu0 %438 }
  0xa1   : > { %v410_v13 = vpop.f32.mrf.mxu0  ;;  %v430_v14 = vpop.f32.mrf.mxu1 }
  0xa2   : > { %v411_v18 = vadd.f32 %v410_v13, %v378_v12  ;;  %v431_v19 = vadd.f32 %v430_v14, %v378_v12 }
  0xaf   : > { %v469_v16 = vpop.f32.mrf.mxu2  ;;  %v489_v17 = vpop.f32.mrf.mxu3 }
  0xb0   : > { %v470_v20 = vadd.f32 %v469_v16, %v439_v15  ;;  %v490_v21 = vadd.f32 %v489_v17, %v439_v15 }
  0xb2   : > { %v492_v22 = vadd.f32 %v470_v20, %v411_v18  ;;  %v493_v23 = vadd.f32 %v490_v21, %v431_v19 }
  0xb4   : > { %v494_v25 = vmax.f32 %v492_v22, 0.0  ;;  %v495_v26 = vmax.f32 %v493_v23, 0.0 }
  0xb6   : > { %v502_v27 = vmul.f32 %v500_v24, %v494_v25  ;;  %v503_v28 = vmul.f32 %v500_v24, %v495_v26 }
  0xb8   : > { %v504_v29 = vrot.slane %v502_v27, 4  ;;  %v510_v30 = vrot.slane %v503_v28, 4 }
  0xba   : > { %v505_v31 = vadd.f32 %v504_v29, %v502_v27  ;;  %v511_v32 = vadd.f32 %v510_v30, %v503_v28 }
  0xbc   : > { %v506_v33 = vrot.slane %v505_v31, 2  ;;  %v512_v34 = vrot.slane %v511_v32, 2 }
  0xbe   : > { %v507_v35 = vadd.f32 %v506_v33, %v505_v31  ;;  %v513_v36 = vadd.f32 %v512_v34, %v511_v32 }
  0xc0   : > { %v508_v37 = vrot.slane %v507_v35, 1  ;;  %v514_v38 = vrot.slane %v513_v36, 1 }
  0xc2   : > { %v509_v40 = vadd.f32 %v508_v37, %v507_v35  ;;  %v515_v41 = vadd.f32 %v514_v38, %v513_v36 }
  0xc4   : > { %v518_v42 = vadd.f32 %v517_v39, %v509_v40  ;;  %v519_v43 = vadd.f32 %v517_v39, %v515_v41 }
  0xc6   : > { %v696_v44 = vmul.f32 -1.442695, %v518_v42  ;;  %v697_v45 = vmul.f32 -1.442695, %v519_v43 }
  0xc8   : > { %764 = vpow2.f32 %v696_v44 }
  0xc9   : > { %766 = vpow2.f32 %v697_v45 }
  0xce   : > { %v765_v46 = vpop.eup %764 }
  0xcf   : > { %v767_v47 = vpop.eup %766  ;;  %v526_v48 = vadd.f32 1.0, %v765_v46 }
  0xd0   : > { %v527_v49 = vadd.f32 1.0, %v767_v47 }
  0xd1   : > { %768 = vrcp.f32 %v526_v48  ;;  %vm533_vm4 = vweird.f32 %v526_v48  ;;  %v539_v61 = vand.u32 2147483648, %v526_v48  ;;  %v537_v63 = vand.u32 2147483647, %v526_v48 }
  0xd2   : > { %770 = vrcp.f32 %v527_v49  ;;  %v554_v57 = vand.u32 2147483648, %v527_v49  ;;  %v552_v59 = vand.u32 2147483647, %v527_v49  ;;  %vm548_vm6 = vweird.f32 %v527_v49 }
  0xd3   : > { %v540_v4 = vor.u32 1.1754944e-38, %v539_v61  ;;  %vm538_vm9 = vcmp.eq.f32.partialorder %v537_v63, 8.507059e+37 }
  0xd4   : > { %v555_v1 = vor.u32 1.1754944e-38, %v554_v57  ;;  %vm553_vm8 = vcmp.eq.f32.partialorder %v552_v59, 8.507059e+37 }
  0xd7   : > { %v769_v50 = vpop.eup %768 }
  0xd8   : > { %v771_v51 = vpop.eup %770  ;;  %v529_v52 = vmul.f32 %v769_v50, %v526_v48  ;;  %vm534_vm2 = vweird.f32 %v769_v50 }
  0xd9   : > { %v544_v53 = vmul.f32 %v771_v51, %v527_v49  ;;  %vm549_vm3 = vweird.f32 %v771_v51  ;;  %vm992_vm5 = vmor %vm533_vm4, %vm534_vm2 }
  0xda   : > { %v530_v54 = vsub.f32 1.0, %v529_v52  ;;  %vm550_vm7 = vmor %vm548_vm6, %vm549_vm3 }
  0xdb   : > { %v545_v55 = vsub.f32 1.0, %v544_v53 }
  0xdc   : > { %v531_v56 = vmul.f32 %v769_v50, %v530_v54 }
  0xdd   : > { %v546_v58 = vmul.f32 %v771_v51, %v545_v55 }
  0xde   : > { %v532_v60 = vadd.f32 %v769_v50, %v531_v56 }
  0xdf   : > { %v547_v0 = vadd.f32 %v771_v51, %v546_v58 }
  0xe0   : > { %v536_v2 = vsel %vm992_vm5, %v769_v50, %v532_v60 }
  0xe1   : > { %v551_v3 = vsel %vm550_vm7, %v771_v51, %v547_v0  ;;  %v541_v8 = vsel %vm538_vm9, %v540_v4, %v536_v2 }
  0xe2   : > { %v556_v6 = vsel %vm553_vm8, %v555_v1, %v551_v3 }
  0xe3   : > { %v560_v7 = vrot.slane %v556_v6, 4 }
  0xe5   : > { %v561_v9 = vsel %vm388_vm0, %v541_v8, %v560_v7 }
  0xe6   : > { %v563_v10 = vmul.f32 %v561_v9, %v973_v5 }
  0xe8   : > { %564 = vst [vmem:[%s350_s10] sm:$0xff] %v563_v10 }
  0xe9   : > { %799 = shalt.err (!%p796_p5)
}
  0xea   : > { %706 = dma.vmem_to_hbm [thread:$0]  (%p941_p4), %s582_s17, 128, %s584_s20, %s566_s21  }
  0xeb PF: > { %p712_p6 = scmp.ge.s32.totalorder %s850_s12, 2  ;;  %s595_s26 = sand.u32 1, %s830_s29  }
  0xec   : > { %s596_s13 = scalar_lea.sflag [#allocation4], %s595_s26 }
  0xed   : > { %p709_p7 = pnand %p712_p6, %p948_p8 }
  0xef   : > { %p710_p9 = pneg %p709_p7 }
  0xf1   : > { %825 = dma.done.wait (%p710_p9), %s596_s13, 128  }
  0xf2   : > { %827 = vsyncadd (%p710_p9), %s596_s13, 4294967168  ;;  %s22_s12 = sadd.s32 1, %s850_s12   ;;  %s1051_s29 = smov %s834_s30 }
  0xf3   : > { %p19_p10 = scmp.ge.s32.totalorder %s22_s12, 4   ;;  %s1052_s30 = smov %s838_s9 }
  0xf4   : > { %s1053_s9 = smov %s954_s19  ;;  %s1054_s10 = smov %s846_s11 }
  0xf5   : > { %s1055_s11 = smov %s1057_s14  ;;  %21 = sbr.rel (!%p19_p10) target bundleno = 6 (0x6), region = 90 }
  0xfa   :  { %602 = vsyncpa [#allocation4], 1 }
  0xfb   :  { %604 = vsyncpa [#allocation4 + $0x1], 1 }

</bundles_post_ra>
